<compile_context>
chip_gen: v7x
topology: tpu7x:2x2x1
jax: 0.10.0
libtpu: 0.0.40
codegen_flags: <defaults>
</compile_context>

<pallas_src>
import math
from functools import partial

import jax
import jax.numpy as jnp
import numpy as np
from jax.experimental import pallas as pl
from jax.experimental.pallas import tpu as pltpu


def _round_up(v, m):
    return (v + m - 1) // m * m


def _fused_fourier_kan_kernel(x_ref, w1_ref, b1_ref, w2_ref, b2_ref, o_ref, *,
                              gridsize):
    """Fused 2-layer FourierKAN forward for one row tile.

    x_ref : (TN, D0)        input rows
    w1_ref: (2*G*D0, H)     fused [cos; sin] layer-1 coefficients
    b1_ref: (1, H)
    w2_ref: (2*G*H, DOP)    fused layer-2 coefficients, columns zero-padded to DOP
    b2_ref: (1, DOP)        zero-padded bias
    o_ref : (TN, DOP)       lane-dense (padded) output
    """

    def fourier_features(v):
        # Angle-addition recurrence: only cos(v), sin(v) use the EUP; higher
        # harmonics are VALU muls/adds. Feature layout (matches the fused
        # weights): [cos blocks g=1..G | sin blocks g=1..G], block g of width d
        # holds cos/sin((g+1)*v). Assembled as a value (single concatenate) so
        # it feeds the MXU directly without a scratch-slab store/reload.
        c1 = jnp.cos(v)
        s1 = jnp.sin(v)
        cos_blocks = [c1]
        sin_blocks = [s1]
        c, s = c1, s1
        for _ in range(1, gridsize):
            c, s = c * c1 - s * s1, s * c1 + c * s1
            cos_blocks.append(c)
            sin_blocks.append(s)
        return jnp.concatenate(cos_blocks + sin_blocks, axis=-1)

    # ---- layer 1 ----
    f1 = fourier_features(x_ref[...])
    h = jnp.dot(f1, w1_ref[...], preferred_element_type=jnp.float32) + b1_ref[...]

    # ---- layer 2 (hidden activation never leaves the chip) ----
    f2 = fourier_features(h)
    y = jnp.dot(f2, w2_ref[...], preferred_element_type=jnp.float32) + b2_ref[...]
    o_ref[...] = y.astype(o_ref.dtype)


def prepare_fourier_kan_params(params, gridsize):
    """One-time weight preparation (hoisted out of the forward hot path).

    Returns arrays already in MXU-friendly (K, d_out) layout with the cos/sin
    blocks fused along K, and the final layer zero-padded to 128 output lanes.
    """
    def fuse(coeffs):  # (2, dout, din, G) -> (2*G*din, dout)
        dout, din = coeffs.shape[1], coeffs.shape[2]
        wc = jnp.transpose(coeffs[0], (2, 1, 0)).reshape(gridsize * din, dout)
        ws = jnp.transpose(coeffs[1], (2, 1, 0)).reshape(gridsize * din, dout)
        return jnp.concatenate([wc, ws], axis=0)

    w1 = fuse(params["coeffs1"])                 # (2*G*d0, h)
    b1 = params["bias1"].astype(jnp.float32)     # (1, h)
    w2 = fuse(params["coeffs2"])                 # (2*G*h, d_out)
    b2 = params["bias2"].astype(jnp.float32)     # (1, d_out)

    d_out = w2.shape[1]
    d_out_pad = _round_up(d_out, 128)            # lane-dense output stores
    w2p = jnp.pad(w2, ((0, 0), (0, d_out_pad - d_out)))
    b2p = jnp.pad(b2, ((0, 0), (0, d_out_pad - d_out)))

    prepared = {
        "w1": w1.astype(jnp.float32),
        "b1": b1,
        "w2": w2p.astype(jnp.float32),
        "b2": b2p,
    }
    return prepared, d_out


def fourier_kan_forward(x, prepared, *, gridsize, d_out, block_rows=512):
    """x: (..., d0) f32. prepared: dict from prepare_fourier_kan_params."""
    lead = x.shape[:-1]
    d0 = x.shape[-1]
    x2d = x.reshape(-1, d0).astype(jnp.float32)
    n = x2d.shape[0]

    w1, b1, w2p, b2p = prepared["w1"], prepared["b1"], prepared["w2"], prepared["b2"]
    k1, h1 = w1.shape
    k2, dop = w2p.shape

    # Row tile: big enough that per-step overhead is amortized and the x/out
    # DMAs pipeline, small enough that live feature values + weights + blocks
    # stay comfortably inside VMEM on every generation.
    tn = block_rows if n >= block_rows else max(8, _round_up(n, 8))
    n_pad = _round_up(n, tn)
    if n_pad != n:
        x2d = jnp.pad(x2d, ((0, n_pad - n), (0, 0)))

    grid = (n_pad // tn,)

    flops = n_pad * (2 * k1 * h1 + 2 * k2 * dop + 6 * (gridsize - 1) * (d0 + h1))
    transcendentals = n_pad * 2 * (d0 + h1)
    bytes_accessed = 4 * (n_pad * d0 + n_pad * dop
                          + k1 * h1 + h1 + k2 * dop + dop)

    out = pl.pallas_call(
        partial(_fused_fourier_kan_kernel, gridsize=gridsize),
        out_shape=jax.ShapeDtypeStruct((n_pad, dop), jnp.float32),
        grid_spec=pltpu.PrefetchScalarGridSpec(
            num_scalar_prefetch=0,
            grid=grid,
            in_specs=[
                pl.BlockSpec((tn, d0), lambda i: (i, 0)),   # x: tiled over rows
                pl.BlockSpec((k1, h1), lambda i: (0, 0)),   # resident weights
                pl.BlockSpec((1, h1), lambda i: (0, 0)),
                pl.BlockSpec((k2, dop), lambda i: (0, 0)),
                pl.BlockSpec((1, dop), lambda i: (0, 0)),
            ],
            out_specs=pl.BlockSpec((tn, dop), lambda i: (i, 0)),
        ),
        compiler_params=pltpu.CompilerParams(
            dimension_semantics=("parallel",),
            vmem_limit_bytes=32 * 1024 * 1024,
        ),
        cost_estimate=pl.CostEstimate(
            flops=int(flops),
            transcendentals=int(transcendentals),
            bytes_accessed=int(bytes_accessed),
        ),
    )(x2d, w1, b1, w2p, b2p)

    y = out[:n, :d_out]
    return y.reshape(*lead, d_out)


# ----------------------------- pure-JAX reference -----------------------------

def _reference_layer(x2d, coeffs, bias, gridsize):
    k = jnp.arange(1, gridsize + 1, dtype=jnp.float32).reshape(1, 1, 1, gridsize)
    xr = x2d.reshape(x2d.shape[0], 1, x2d.shape[1], 1)
    c = jnp.cos(k * xr)
    s = jnp.sin(k * xr)
    y = jnp.sum(c * coeffs[0:1], axis=(-2, -1))
    y = y + jnp.sum(s * coeffs[1:2], axis=(-2, -1))
    return y + bias


def _reference_forward(x, params, gridsize):
    lead = x.shape[:-1]
    x2d = x.reshape(-1, x.shape[-1])
    h = _reference_layer(x2d, params["coeffs1"], params["bias1"], gridsize)
    y = _reference_layer(h, params["coeffs2"], params["bias2"], gridsize)
    return y.reshape(*lead, y.shape[-1])


if __name__ == "__main__":
    layers = (16, 32, 8)   # (inputdim, hidden, outdim)
    gridsize = 5
    batch, seq = 2, 4      # x has shape (batch, seq, layers[0])

    key = jax.random.PRNGKey(0)
    k_x, k_c1, k_c2 = jax.random.split(key, 3)

    x = jax.random.normal(k_x, (batch, seq, layers[0]), dtype=jnp.float32)

    # Deterministic parameter init matching NaiveFourierKANLayer.__init__:
    #   fouriercoeffs ~ randn(2, outdim, inputdim, gridsize)/(sqrt(inputdim)*sqrt(gridsize))
    #   bias = zeros(1, outdim)
    params = {
        "coeffs1": jax.random.normal(k_c1, (2, layers[1], layers[0], gridsize),
                                     dtype=jnp.float32)
                   / (math.sqrt(layers[0]) * math.sqrt(gridsize)),
        "bias1": jnp.zeros((1, layers[1]), dtype=jnp.float32),
        "coeffs2": jax.random.normal(k_c2, (2, layers[2], layers[1], gridsize),
                                     dtype=jnp.float32)
                   / (math.sqrt(layers[1]) * math.sqrt(gridsize)),
        "bias2": jnp.zeros((1, layers[2]), dtype=jnp.float32),
    }

    # One-time weight preparation (fused [cos;sin] layout, padded output lanes).
    prepared, d_out = prepare_fourier_kan_params(params, gridsize)

    out = fourier_kan_forward(x, prepared, gridsize=gridsize, d_out=d_out)
    out = jax.block_until_ready(out)

    ref = jax.block_until_ready(_reference_forward(x, params, gridsize))
    np.testing.assert_allclose(np.asarray(out), np.asarray(ref),
                               rtol=1e-4, atol=1e-4)

    assert out.shape == (batch, seq, layers[2])
    print("KERNEL_OK")
</pallas_src>

<mosaic_0001>
module attributes {stable_mosaic.version = 11 : i64} {
  func.func @_fused_fourier_kan_kernel(%arg0: i32, %arg1: memref<8x16xf32, #tpu.memory_space<vmem>>, %arg2: memref<160x32xf32, #tpu.memory_space<vmem>>, %arg3: memref<1x32xf32, #tpu.memory_space<vmem>>, %arg4: memref<320x128xf32, #tpu.memory_space<vmem>>, %arg5: memref<1x128xf32, #tpu.memory_space<vmem>>, %arg6: memref<8x128xf32, #tpu.memory_space<vmem>>) attributes {dimension_semantics = [#tpu.dimension_semantics<parallel>], iteration_bounds = array<i64: 1>, scalar_prefetch = 0 : i64, scratch_operands = 0 : i64, tpu.core_type = #tpu.core_type<tc>, window_params = [{transform_indices = @transform_0, window_bounds = array<i64: 8, 16>}, {pipeline_mode = #tpu.pipeline_mode<synchronous>, transform_indices = @transform_1, window_bounds = array<i64: 160, 32>}, {pipeline_mode = #tpu.pipeline_mode<synchronous>, transform_indices = @transform_2, window_bounds = array<i64: 1, 32>}, {pipeline_mode = #tpu.pipeline_mode<synchronous>, transform_indices = @transform_3, window_bounds = array<i64: 320, 128>}, {pipeline_mode = #tpu.pipeline_mode<synchronous>, transform_indices = @transform_4, window_bounds = array<i64: 1, 128>}, {transform_indices = @transform_5, window_bounds = array<i64: 8, 128>}]} {
    %c0 = arith.constant 0 : index
    %c0_0 = arith.constant 0 : index
    %0 = vector.load %arg1[%c0, %c0_0] : memref<8x16xf32, #tpu.memory_space<vmem>>, vector<8x16xf32>
    %1 = math.cos %0 : vector<8x16xf32>
    %2 = math.sin %0 : vector<8x16xf32>
    %3 = arith.mulf %1, %1 : vector<8x16xf32>
    %4 = arith.mulf %2, %2 : vector<8x16xf32>
    %5 = arith.subf %3, %4 : vector<8x16xf32>
    %6 = arith.mulf %2, %1 : vector<8x16xf32>
    %7 = arith.mulf %1, %2 : vector<8x16xf32>
    %8 = arith.addf %6, %7 : vector<8x16xf32>
    %9 = arith.mulf %5, %1 : vector<8x16xf32>
    %10 = arith.mulf %8, %2 : vector<8x16xf32>
    %11 = arith.subf %9, %10 : vector<8x16xf32>
    %12 = arith.mulf %8, %1 : vector<8x16xf32>
    %13 = arith.mulf %5, %2 : vector<8x16xf32>
    %14 = arith.addf %12, %13 : vector<8x16xf32>
    %15 = arith.mulf %11, %1 : vector<8x16xf32>
    %16 = arith.mulf %14, %2 : vector<8x16xf32>
    %17 = arith.subf %15, %16 : vector<8x16xf32>
    %18 = arith.mulf %14, %1 : vector<8x16xf32>
    %19 = arith.mulf %11, %2 : vector<8x16xf32>
    %20 = arith.addf %18, %19 : vector<8x16xf32>
    %21 = arith.mulf %17, %1 : vector<8x16xf32>
    %22 = arith.mulf %20, %2 : vector<8x16xf32>
    %23 = arith.subf %21, %22 : vector<8x16xf32>
    %24 = arith.mulf %20, %1 : vector<8x16xf32>
    %25 = arith.mulf %17, %2 : vector<8x16xf32>
    %26 = arith.addf %24, %25 : vector<8x16xf32>
    %27 = tpu.concatenate %1, %5, %11, %17, %23, %2, %8, %14, %20, %26 in 1 : vector<8x16xf32>, vector<8x16xf32>, vector<8x16xf32>, vector<8x16xf32>, vector<8x16xf32>, vector<8x16xf32>, vector<8x16xf32>, vector<8x16xf32>, vector<8x16xf32>, vector<8x16xf32> -> vector<8x160xf32>
    %c0_1 = arith.constant 0 : index
    %c0_2 = arith.constant 0 : index
    %28 = vector.load %arg2[%c0_1, %c0_2] : memref<160x32xf32, #tpu.memory_space<vmem>>, vector<160x32xf32>
    %cst = arith.constant dense<0.000000e+00> : vector<8x32xf32>
    %29 = tpu.matmul %27, %28, %cst {dimension_numbers = #tpu.dot_dimension_numbers<[1], [0], [0], [1], [0, 0, 1, 1], [], []>} : vector<8x160xf32>, vector<160x32xf32>, vector<8x32xf32> -> vector<8x32xf32>
    %c0_3 = arith.constant 0 : index
    %c0_4 = arith.constant 0 : index
    %30 = vector.load %arg3[%c0_3, %c0_4] : memref<1x32xf32, #tpu.memory_space<vmem>>, vector<1x32xf32>
    %31 = vector.broadcast %30 : vector<1x32xf32> to vector<8x32xf32>
    %32 = arith.addf %29, %31 : vector<8x32xf32>
    %33 = math.cos %32 : vector<8x32xf32>
    %34 = math.sin %32 : vector<8x32xf32>
    %35 = arith.mulf %33, %33 : vector<8x32xf32>
    %36 = arith.mulf %34, %34 : vector<8x32xf32>
    %37 = arith.subf %35, %36 : vector<8x32xf32>
    %38 = arith.mulf %34, %33 : vector<8x32xf32>
    %39 = arith.mulf %33, %34 : vector<8x32xf32>
    %40 = arith.addf %38, %39 : vector<8x32xf32>
    %41 = arith.mulf %37, %33 : vector<8x32xf32>
    %42 = arith.mulf %40, %34 : vector<8x32xf32>
    %43 = arith.subf %41, %42 : vector<8x32xf32>
    %44 = arith.mulf %40, %33 : vector<8x32xf32>
    %45 = arith.mulf %37, %34 : vector<8x32xf32>
    %46 = arith.addf %44, %45 : vector<8x32xf32>
    %47 = arith.mulf %43, %33 : vector<8x32xf32>
    %48 = arith.mulf %46, %34 : vector<8x32xf32>
    %49 = arith.subf %47, %48 : vector<8x32xf32>
    %50 = arith.mulf %46, %33 : vector<8x32xf32>
    %51 = arith.mulf %43, %34 : vector<8x32xf32>
    %52 = arith.addf %50, %51 : vector<8x32xf32>
    %53 = arith.mulf %49, %33 : vector<8x32xf32>
    %54 = arith.mulf %52, %34 : vector<8x32xf32>
    %55 = arith.subf %53, %54 : vector<8x32xf32>
    %56 = arith.mulf %52, %33 : vector<8x32xf32>
    %57 = arith.mulf %49, %34 : vector<8x32xf32>
    %58 = arith.addf %56, %57 : vector<8x32xf32>
    %59 = tpu.concatenate %33, %37, %43, %49, %55, %34, %40, %46, %52, %58 in 1 : vector<8x32xf32>, vector<8x32xf32>, vector<8x32xf32>, vector<8x32xf32>, vector<8x32xf32>, vector<8x32xf32>, vector<8x32xf32>, vector<8x32xf32>, vector<8x32xf32>, vector<8x32xf32> -> vector<8x320xf32>
    %c0_5 = arith.constant 0 : index
    %c0_6 = arith.constant 0 : index
    %60 = vector.load %arg4[%c0_5, %c0_6] : memref<320x128xf32, #tpu.memory_space<vmem>>, vector<320x128xf32>
    %cst_7 = arith.constant dense<0.000000e+00> : vector<8x128xf32>
    %61 = tpu.matmul %59, %60, %cst_7 {dimension_numbers = #tpu.dot_dimension_numbers<[1], [0], [0], [1], [0, 0, 1, 1], [], []>} : vector<8x320xf32>, vector<320x128xf32>, vector<8x128xf32> -> vector<8x128xf32>
    %c0_8 = arith.constant 0 : index
    %c0_9 = arith.constant 0 : index
    %62 = vector.load %arg5[%c0_8, %c0_9] : memref<1x128xf32, #tpu.memory_space<vmem>>, vector<1x128xf32>
    %63 = vector.broadcast %62 : vector<1x128xf32> to vector<8x128xf32>
    %64 = arith.addf %61, %63 : vector<8x128xf32>
    %c0_10 = arith.constant 0 : index
    %c0_11 = arith.constant 0 : index
    %65 = vector.load %arg6[%c0_10, %c0_11] : memref<8x128xf32, #tpu.memory_space<vmem>>, vector<8x128xf32>
    tpu.vector_store %arg6[%c0_10, %c0_11], %64 {strides = array<i32>} : memref<8x128xf32, #tpu.memory_space<vmem>>, vector<8x128xf32>,
    return
  }
  func.func @transform_0(%arg0: i32) -> (i32, i32) {
    %c0_i32 = arith.constant 0 : i32
    %c0_i32_0 = arith.constant 0 : i32
    return %arg0, %c0_i32 : i32, i32
  }
  func.func @transform_1(%arg0: i32) -> (i32, i32) {
    %c0_i32 = arith.constant 0 : i32
    %c0_i32_0 = arith.constant 0 : i32
    %c0_i32_1 = arith.constant 0 : i32
    return %c0_i32, %c0_i32_0 : i32, i32
  }
  func.func @transform_2(%arg0: i32) -> (i32, i32) {
    %c0_i32 = arith.constant 0 : i32
    %c0_i32_0 = arith.constant 0 : i32
    %c0_i32_1 = arith.constant 0 : i32
    return %c0_i32, %c0_i32_0 : i32, i32
  }
  func.func @transform_3(%arg0: i32) -> (i32, i32) {
    %c0_i32 = arith.constant 0 : i32
    %c0_i32_0 = arith.constant 0 : i32
    %c0_i32_1 = arith.constant 0 : i32
    return %c0_i32, %c0_i32_0 : i32, i32
  }
  func.func @transform_4(%arg0: i32) -> (i32, i32) {
    %c0_i32 = arith.constant 0 : i32
    %c0_i32_0 = arith.constant 0 : i32
    %c0_i32_1 = arith.constant 0 : i32
    return %c0_i32, %c0_i32_0 : i32, i32
  }
  func.func @transform_5(%arg0: i32) -> (i32, i32) {
    %c0_i32 = arith.constant 0 : i32
    %c0_i32_0 = arith.constant 0 : i32
    return %arg0, %c0_i32 : i32, i32
  }
}

</mosaic_0001>

<bundles_post_ra>
// kernel: tpu_custom_call.1
= control target key start
LH: loop header
LB: loop body
LE: loop exit
PB: predicated region body
PF: predicated region fallthrough
CT: control target
= control target key end

     0   :  { %10 = vsyncpa [#allocation3], 0  ;;  %s1388_s0 = inlined_call_operand.vmem [shape: f32[8,16], index: 0, kind: input, shape index: {}]   ;;  %s1389_s1 = inlined_call_operand.vmem [shape: f32[160,32], index: 1, kind: input, shape index: {}]   ;;  %s1390_s2 = inlined_call_operand.vmem [shape: f32[1,32], index: 2, kind: input, shape index: {}]   ;;  %s1391_s3 = inlined_call_operand.hbm [shape: f32[320,128], index: 3, kind: input, shape index: {}]   ;;  %s1392_s4 = inlined_call_operand.vmem [shape: f32[1,128], index: 4, kind: input, shape index: {}]   ;;  %s1393_s5 = inlined_call_operand.hbm [shape: f32[8,128], index: 5, kind: output, shape index: {}]  }
   0x1   :  { %11 = vsyncpa [#allocation4], 0  ;;  %s1140_s18 = smov [#allocation2]   ;;  %s1092_s22 = scalar_lea.hbm %s1391_s3, 5120 }
   0x2   :  { %s23_s19 = sshll.u32 %s1140_s18, 4  ;;  %p1093_p0 = scmp.ne.s32.totalorder %s1391_s3, %s1092_s22  ;;  %s24_s19 = int_to_ptr.vmem [resolvable:$true] %s23_s19 }
   0x3   :  { %p1096_p1 = scmp.lt.u32.totalorder %s1092_s22, %s1391_s3 }
   0x5   :  { %p1098_p2 = pnand %p1096_p1, %p1093_p0 }
   0x7   :  { %1101 = shalt.err (!%p1098_p2)
}
   0x8   :  { %s1102_s27 = scalar_lea.vmem %s24_s19, 5120  ;;  %p1107_p4 = scmp.lt.s32.totalorder %s24_s19, %s24_s19 }
   0x9   :  { %p1103_p3 = scmp.ne.s32.totalorder %s24_s19, %s1102_s27  ;;  %p1108_p5 = scmp.lt.s32.totalorder %s1102_s27, %s1102_s27 }
   0xb   :  { %p1109_p6 = por %p1108_p5, %p1107_p4 }
   0xd   :  { %p1110_p7 = pnand %p1109_p6, %p1103_p3 }
   0xf   :  { %1113 = shalt.err (!%p1110_p7)
}
  0x10   :  { %s1141_s28 = smov 128   ;;  %s1142_s29 = smov 8  }
  0x11   :  { %29 = dma.hbm_to_vmem [thread:$0]  %s1391_s3, 5120, %s24_s19, [#allocation3], %s1141_s28, %s1141_s28, %s1142_s29  }
  0x12   :  { %1136 = dma.done.wait [#allocation3], 5120  }
  0x13   :  { %1137 = vsyncadd [#allocation3], 4294962176  ;;  %v1143_v0 = vmov 0.0|0.0   ;;  %v1206_v1 = vld [vmem:[%s1388_s0] sm:$0xff]  ;;  %v314_v3 = vld [vmem:[%s1389_s1 + $0x8] sm:$0xff]  ;;  %s1150_s16 = smov 80  }
  0x14   :  { %967 = vmatprep.subr.bf16.mxu0 %v1143_v0  ;;  %v313_v2 = vld [vmem:[%s1389_s1] sm:$0xff]  ;;  %v39_v4 = vand.u32 2139095040, %v1206_v1  ;;  %v315_v5 = vld [vmem:[%s1389_s1 + $0x10] sm:$0xff]  ;;  %v316_v6 = vld [vmem:[%s1389_s1 + $0x18] sm:$0xff]  ;;  %v36_v9 = vand.u32 2147483647, %v1206_v1  ;;  %vm128_vm15 = vweird.f32 %v1206_v1 }
  0x15   :  { %v968_v7 = vpack.c.bf16 %v314_v3, %v313_v2  ;;  %v971_v10 = vpack.c.bf16 %v316_v6, %v315_v5  ;;  %v317_v12 = vld [vmem:[%s1389_s1 + $0x20] sm:$0xff]  ;;  %v318_v13 = vld [vmem:[%s1389_s1 + $0x28] sm:$0xff]  ;;  %v319_v17 = vld [vmem:[%s1389_s1 + $0x30] sm:$0xff]  ;;  %v1144_v27 = vmov 683565275   ;;  %vm38_vm7 = vcmp.lt.s32.totalorder %v1206_v1, 0 }
  0x16   :  { %v40_v8 = vshrl.u32 %v39_v4, 23  ;;  %v43_v15 = vand.u32 8388607, %v36_v9  ;;  %v974_v16 = vpack.c.bf16 %v318_v13, %v317_v12  ;;  %v320_v18 = vld [vmem:[%s1389_s1 + $0x38] sm:$0xff]  ;;  %v321_v21 = vld [vmem:[%s1389_s1 + $0x40] sm:$0xff]  ;;  %v322_v22 = vld [vmem:[%s1389_s1 + $0x48] sm:$0xff] }
  0x17   :  { %969 = vmatpush1.bf16.msra.mxu0 %v968_v7  ;;  %v977_v25 = vpack.c.bf16 %v320_v18, %v319_v17  ;;  %v1145_v29 = vmov 2475754826   ;;  %v1146_v31 = vmov 2131351028   ;;  %v1147_v33 = vmov 2102212464  }
  0x18   :  { %v884_v11 = vadd.s32 4294967169, %v40_v8  ;;  %970 = vmatprep.subr.bf16.mxu0 %v1143_v0  ;;  %v44_v23 = vor.u32 8388608, %v43_v15  ;;  %v1148_v35 = vmov 920167782   ;;  %v980_v37 = vpack.c.bf16 %v322_v22, %v321_v21  ;;  %v323_v49 = vld [vmem:[%s1389_s1 + $0x50] sm:$0xff]  ;;  %v324_v50 = vld [vmem:[%s1389_s1 + $0x58] sm:$0xff] }
  0x19   :  { %v1149_v43 = vmov 1326507024   ;;  %v983_v60 = vpack.c.bf16 %v324_v50, %v323_v49  ;;  %vm37_vm8 = vcmp.le.f32.partialorder %v36_v9, 0.7853982  ;;  %s1151_s21 = smov 16   ;;  %s1152_s22 = smov 96  }
  0x1a   :  { %v46_v14 = vadd.s32 1, %v884_v11  ;;  %v84_v45 = vshll.u32 %v44_v23, 8  ;;  %s1153_s23 = smov 32   ;;  %s1155_s24 = smov 64  }
  0x1b   :  { %972 = vmatpush1.bf16.msra.mxu0 %v971_v10  ;;  %s1156_s25 = smov 112   ;;  %s1159_s29 = smov [#allocation5]  }
  0x1c   :  { %vm47_vm0 = vcmp.gt.s32.totalorder %v46_v14, 0  ;;  %973 = vmatprep.subr.bf16.mxu0 %v1143_v0  ;;  %s875_s30 = sshll.u32 %s1159_s29, 4  ;;  %s876_s30 = int_to_ptr.vmem [resolvable:$true] %s875_s30 }
  0x1d   :  { %v48_v19 = vsel %vm47_vm0, %v46_v14, 0  ;;  %vm298_vm0 = vcmask 130048   ;;  %s1114_s6 = scalar_lea.vmem %s876_s30, 128  ;;  %p1119_p9 = scmp.lt.s32.totalorder %s876_s30, %s876_s30 }
  0x1e   :  { %v50_v20 = vand.u32 31, %v48_v19  ;;  %v49_v24 = vshrl.u32 %v48_v19, 5  ;;  %p1115_p8 = scmp.ne.s32.totalorder %s876_s30, %s1114_s6  ;;  %p1120_p10 = scmp.lt.s32.totalorder %s1114_s6, %s1114_s6 }
  0x1f   :  { %975 = vmatpush1.bf16.msra.mxu0 %v974_v16 }
  0x20   :  { %v51_v26 = vsub.s32 32, %v50_v20  ;;  %v53_v28 = vshll.u32 %v1144_v27, %v50_v20  ;;  %v56_v30 = vshll.u32 %v1145_v29, %v50_v20  ;;  %v59_v32 = vshll.u32 %v1146_v31, %v50_v20  ;;  %976 = vmatprep.subr.bf16.mxu0 %v1143_v0  ;;  %p1121_p11 = por %p1120_p10, %p1119_p9 }
  0x21   :  { %v62_v34 = vshll.u32 %v1147_v33, %v50_v20  ;;  %v65_v36 = vshll.u32 %v1148_v35, %v50_v20  ;;  %vm68_vm1 = vcmp.lt.s32.totalorder %v49_v24, 1  ;;  %vm71_vm2 = vcmp.lt.s32.totalorder %v49_v24, 4 }
  0x22   :  { %v52_v38 = vshrl.u32 %v1144_v27, %v51_v26  ;;  %v54_v39 = vshrl.u32 %v1145_v29, %v51_v26  ;;  %v57_v40 = vshrl.u32 %v1146_v31, %v51_v26  ;;  %v60_v41 = vshrl.u32 %v1147_v33, %v51_v26  ;;  %p1122_p12 = pnand %p1121_p11, %p1115_p8 }
  0x23   :  { %v63_v42 = vshrl.u32 %v1148_v35, %v51_v26  ;;  %v66_v44 = vshrl.u32 %v1149_v43, %v51_v26  ;;  %978 = vmatpush1.bf16.msra.mxu0 %v977_v25  ;;  %vm69_vm3 = vcmp.lt.s32.totalorder %v49_v24, 2  ;;  %vm70_vm4 = vcmp.lt.s32.totalorder %v49_v24, 3 }
  0x24   :  { %v55_v46 = vor.u32 %v54_v39, %v53_v28  ;;  %v58_v47 = vor.u32 %v57_v40, %v56_v30  ;;  %v61_v48 = vor.u32 %v60_v41, %v59_v32  ;;  %979 = vmatprep.subr.bf16.mxu0 %v1143_v0 }
  0x25   :  { %v64_v51 = vor.u32 %v63_v42, %v62_v34  ;;  %v67_v52 = vor.u32 %v66_v44, %v65_v36 }
  0x26   :  { %v72_v53 = vsel %vm68_vm1, %v52_v38, %v55_v46  ;;  %v73_v54 = vsel %vm71_vm2, %v61_v48, 2102212464  ;;  %v76_v55 = vsel %vm68_vm1, %v55_v46, %v58_v47  ;;  %v80_v56 = vsel %vm68_vm1, %v58_v47, %v61_v48 }
  0x27   :  { %v74_v57 = vsel %vm70_vm4, %v58_v47, %v73_v54  ;;  %v77_v58 = vsel %vm71_vm2, %v64_v51, 920167782  ;;  %v81_v59 = vsel %vm71_vm2, %v67_v52, 1326507024  ;;  %981 = vmatpush1.bf16.msra.mxu0 %v980_v37  ;;  %v325_v47 = vld [vmem:[%s1389_s1 + $0x60] sm:$0xff]  ;;  %v328_v52 = vld [vmem:[%s1389_s1 + $0x78] sm:$0xff] }
  0x28   :  { %v78_v61 = vsel %vm70_vm4, %v61_v48, %v77_v58  ;;  %v82_v62 = vsel %vm70_vm4, %v64_v51, %v81_v59  ;;  %982 = vmatprep.subr.bf16.mxu0 %v1143_v0  ;;  %v75_v63 = vsel %vm69_vm3, %v72_v53, %v74_v57  ;;  %v326_v48 = vld [vmem:[%s1389_s1 + $0x68] sm:$0xff]  ;;  %v327_v51 = vld [vmem:[%s1389_s1 + $0x70] sm:$0xff]  ;;  %vm300_vm1 = vcmask 261120  }
  0x29   :  { %v79_v2 = vsel %vm69_vm3, %v76_v55, %v78_v61  ;;  %v83_v3 = vsel %vm69_vm3, %v80_v56, %v82_v62  ;;  %v91_v8 = vmul.u32 %v84_v45, %v75_v63  ;;  %v986_v49 = vpack.c.bf16 %v326_v48, %v325_v47 }
  0x2a   :  { %v1270_v4 = vmul.u32.u64.low %v84_v45, %v83_v3  ;;  %v1271_v5 = vmul.u32.u64.high %v84_v45, %v83_v3, %v1270_v4  ;;  %v1273_v6 = vmul.u32.u64.low %v84_v45, %v79_v2  ;;  %v1274_v7 = vmul.u32.u64.high %v84_v45, %v79_v2, %v1273_v6 }
  0x2b   :  { %984 = vmatpush1.bf16.msra.mxu0 %v983_v60  ;;  %v989_v53 = vpack.c.bf16 %v328_v52, %v327_v51  ;;  %v329_v4 = vld [vmem:[%s1389_s1 + $0x80] sm:$0xff]  ;;  %vm302_vm2 = vcmask 392192   ;;  %vm304_vm3 = vcmask 523264   ;;  %vm306_vm4 = vcmask 654336  }
  0x2c   :  { %985 = vmatprep.subr.bf16.mxu0 %v1143_v0  ;;  %vm93_vm5 = vc.u32 %v1271_v5, %v1273_v6  ;;  %v94_v10 = vadd.s32 1, %v1274_v7  ;;  %v92_v21 = vadd.s32 %v1273_v6, %v1271_v5  ;;  %v330_v5 = vld [vmem:[%s1389_s1 + $0x88] sm:$0xff] }
  0x2e   :  { %v95_v11 = vsel %vm93_vm5, %v94_v10, %v1274_v7  ;;  %vm308_vm5 = vcmask 785408  }
  0x2f   :  { %v96_v12 = vadd.s32 %v95_v11, %v91_v8  ;;  %987 = vmatpush1.bf16.msra.mxu0 %v986_v49  ;;  %v992_v8 = vpack.c.bf16 %v330_v5, %v329_v4  ;;  %v699_v4 = vld [vmem:[#allocation2 + $0xa8] sm:$0xff] }
  0x30   :  { %988 = vmatprep.subr.bf16.mxu0 %v1143_v0 }
  0x31   :  { %v97_v13 = vadd.s32 536870912, %v96_v12 }
  0x33   :  { %v98_v14 = vshrl.u32 %v97_v13, 30  ;;  %990 = vmatpush1.bf16.msra.mxu0 %v989_v53  ;;  %v332_v13 = vld [vmem:[%s1389_s1 + $0x98] sm:$0xff] }
  0x34   :  { %991 = vmatprep.subr.bf16.mxu0 %v1143_v0 }
  0x35   :  { %v99_v15 = vshll.u32 %v98_v14, 30  ;;  %v122_v38 = vsub.s32 4, %v98_v14 }
  0x37   :  { %v100_v16 = vsub.s32 %v96_v12, %v99_v15  ;;  %v123_v41 = vsel %vm38_vm7, %v122_v38, %v98_v14  ;;  %993 = vmatpush1.bf16.msra.mxu0 %v992_v8  ;;  %v331_v12 = vld [vmem:[%s1389_s1 + $0x90] sm:$0xff]  ;;  %s1154_s1 = smov 48  }
  0x38   :  { %v125_v45 = vsel %vm37_vm8, 0, %v123_v41  ;;  %994 = vmatprep.subr.bf16.mxu0 %v1143_v0  ;;  %v700_v8 = vld [vmem:[#allocation2 + $0xb0] sm:$0xff] }
  0x39   :  { %v102_v17 = vsub.s32 0, %v100_v16  ;;  %v232_v46 = vadd.s32 3, %v125_v45  ;;  %v129_v50 = vand.u32 3, %v125_v45 }
  0x3b   :  { %v885_v18 = vmin.u32 %v102_v17, %v100_v16  ;;  %v233_v9 = vand.u32 3, %v232_v46  ;;  %vm134_vm9 = vcmp.eq.s32.totalorder %v129_v50, 2  ;;  %vm131_vm11 = vcmp.eq.s32.totalorder %v129_v50, 0 }
  0x3c   :  { %vm130_vm13 = vcmp.lt.s32.totalorder %v129_v50, 2 }
  0x3d   :  { %v104_v19 = vclz %v885_v18  ;;  %vm238_vm10 = vcmp.eq.s32.totalorder %v233_v9, 2  ;;  %vm235_vm12 = vcmp.eq.s32.totalorder %v233_v9, 0  ;;  %vm234_vm14 = vcmp.lt.s32.totalorder %v233_v9, 2 }
  0x3e   :  { %v995_v18 = vpack.c.bf16 %v332_v13, %v331_v12  ;;  %v684_v13 = vld [vmem:[#allocation2 + $0x30] sm:$0xff] }
  0x3f   :  { %v886_v20 = vadd.s32 4294967294, %v104_v19 }
  0x40   :  { %996 = vmatpush1.bf16.msra.mxu0 %v995_v18 }
  0x41   :  { %vm887_vm6 = vcmp.lt.s32.totalorder %v886_v20, 0 }
  0x42   :  { %v107_v22 = vsel %vm887_vm6, 0, %v886_v20  ;;  %vm310_vm6 = vcmask 916480  }
  0x43   :  { %v108_v23 = vsub.s32 32, %v107_v22  ;;  %v109_v24 = vshll.u32 %v100_v16, %v107_v22  ;;  %v112_v25 = vsub.s32 4294967266, %v107_v22 }
  0x45   :  { %v110_v26 = vshrl.u32 %v92_v21, %v108_v23  ;;  %v113_v28 = vadd.s32 127, %v112_v25 }
  0x47   :  { %v111_v30 = vor.u32 %v110_v26, %v109_v24  ;;  %v114_v32 = vshll.u32 %v113_v28, 23 }
  0x49   :  { %v115_v34 = vor.u32 4788187, %v114_v32  ;;  %v118_v36 = vcvt.s32.f32 %v111_v30 }
  0x4b   :  { %v116_v37 = vand.u32 2147483647, %v115_v34 }
  0x4d   :  { %v119_v39 = vmul.f32 %v118_v36, %v116_v37 }
  0x4f   :  { %v120_v40 = vxor.u32 2147483648, %v119_v39 }
  0x51   :  { %v121_v42 = vsel %vm38_vm7, %v120_v40, %v119_v39 }
  0x52   :  { %v124_v44 = vsel %vm37_vm8, %v1206_v1, %v121_v42 }
  0x53   :  { %1084 = vcosq.f32 %v124_v44 }
  0x54   :  { %1086 = vsinq.f32 %v124_v44 }
  0x5d   :  { %v1085_v54 = vpop.eup %1084 }
  0x5e   :  { %v1087_v55 = vpop.eup %1086  ;;  %v135_v56 = vxor.u32 2147483648, %v1085_v54 }
  0x5f   :  { %v132_v57 = vxor.u32 2147483648, %v1087_v55 }
  0x60   :  { %v240_v58 = vsel %vm238_vm10, %v135_v56, %v1087_v55  ;;  %v136_v59 = vsel %vm134_vm9, %v135_v56, %v1087_v55  ;;  %v695_v55 = vld [vmem:[#allocation2 + $0x88] sm:$0xff]  ;;  %v678_v56 = vld [vmem:[#allocation2] sm:$0xff] }
  0x61   :  { %v237_v60 = vsel %vm235_vm12, %v1085_v54, %v132_v57  ;;  %v133_v61 = vsel %vm131_vm11, %v1085_v54, %v132_v57  ;;  %v694_v54 = vld [vmem:[#allocation2 + $0x80] sm:$0xff] }
  0x62   :  { %v241_v62 = vsel %vm234_vm14, %v237_v60, %v240_v58  ;;  %v137_v63 = vsel %vm130_vm13, %v133_v61, %v136_v59  ;;  %v997_v57 = vpack.c.bf16 %v695_v55, %v694_v54  ;;  %v679_v58 = vld [vmem:[#allocation2 + $0x8] sm:$0xff]  ;;  %v696_v59 = vld [vmem:[#allocation2 + $0x90] sm:$0xff]  ;;  %v697_v60 = vld [vmem:[#allocation2 + $0x98] sm:$0xff] }
  0x63   :  { %v242_v2 = vsel %vm128_vm15, nan, %v241_v62  ;;  %v138_v3 = vsel %vm128_vm15, nan, %v137_v63  ;;  %v999_v61 = vpack.c.bf16 %v679_v58, %v678_v56  ;;  %v1001_v62 = vpack.c.bf16 %v697_v60, %v696_v59  ;;  %v680_v63 = vld [vmem:[#allocation2 + $0x10] sm:$0xff] }
  0x64   :  { %283 = vrot.lane.b32.xlu0 %v242_v2, %s1150_s16  ;;  %v243_v6 = vmul.f32 %v138_v3, %v138_v3  ;;  %v244_v1 = vmul.f32 %v242_v2, %v242_v2  ;;  %v246_v7 = vmul.f32 %v242_v2, %v138_v3  ;;  %998 = vmatprep.subr.bf16.mxu1 %v997_v57 }
  0x65   :  { %1000 = vmatpush3.bf16.msra.mxu1 %v999_v61 }
  0x66   :  { %v245_v10 = vsub.f32 %v243_v6, %v244_v1  ;;  %v247_v11 = vadd.f32 %v246_v7, %v246_v7  ;;  %1002 = vmatprep.subr.bf16.mxu1 %v1001_v62  ;;  %v682_v1 = vld [vmem:[#allocation2 + $0x20] sm:$0xff]  ;;  %v683_v7 = vld [vmem:[#allocation2 + $0x28] sm:$0xff] }
  0x68   :  { %267 = vrot.lane.b32.xlu0 %v245_v10, %s1151_s21  ;;  %v252_v14 = vmul.f32 %v245_v10, %v242_v2  ;;  %287 = vrot.lane.b32.xlu1 %v247_v11, %s1152_s22  ;;  %v251_v15 = vmul.f32 %v247_v11, %v138_v3  ;;  %v248_v16 = vmul.f32 %v245_v10, %v138_v3  ;;  %v701_v10 = vld [vmem:[#allocation2 + $0xb8] sm:$0xff] }
  0x69   :  { %v249_v17 = vmul.f32 %v247_v11, %v242_v2  ;;  %v1007_v11 = vpack.c.bf16 %v683_v7, %v682_v1  ;;  %v1009_v12 = vpack.c.bf16 %v701_v10, %v700_v8 }
  0x6a   :  { %v253_v19 = vadd.f32 %v252_v14, %v251_v15  ;;  %v685_v14 = vld [vmem:[#allocation2 + $0x38] sm:$0xff]  ;;  %v702_v15 = vld [vmem:[#allocation2 + $0xc0] sm:$0xff] }
  0x6b   :  { %v250_v20 = vsub.f32 %v248_v16, %v249_v17  ;;  %v703_v16 = vld [vmem:[#allocation2 + $0xc8] sm:$0xff]  ;;  %v1011_v17 = vpack.c.bf16 %v685_v14, %v684_v13 }
  0x6c   :  { %v255_v21 = vmul.f32 %v253_v19, %v242_v2  ;;  %v257_v22 = vmul.f32 %v253_v19, %v138_v3  ;;  %v1013_v18 = vpack.c.bf16 %v703_v16, %v702_v15 }
  0x6d   :  { %271 = vrot.lane.b32.xlu0 %v250_v20, %s1153_s23  ;;  %v258_v23 = vmul.f32 %v250_v20, %v242_v2  ;;  %v254_v24 = vmul.f32 %v250_v20, %v138_v3  ;;  %v687_v20 = vld [vmem:[#allocation2 + $0x48] sm:$0xff] }
  0x6f   :  { %v256_v25 = vsub.f32 %v254_v24, %v255_v21  ;;  %v259_v26 = vadd.f32 %v258_v23, %v257_v22  ;;  %v704_v21 = vld [vmem:[#allocation2 + $0xd0] sm:$0xff]  ;;  %v705_v22 = vld [vmem:[#allocation2 + $0xd8] sm:$0xff] }
  0x70   :  { %v1017_v24 = vpack.c.bf16 %v705_v22, %v704_v21 }
  0x71   :  { %275 = vrot.lane.b32.xlu1 %v256_v25, %s1154_s1  ;;  %v260_v28 = vmul.f32 %v256_v25, %v138_v3  ;;  %v261_v30 = vmul.f32 %v259_v26, %v242_v2  ;;  %v263_v32 = vmul.f32 %v259_v26, %v138_v3  ;;  %v264_v34 = vmul.f32 %v256_v25, %v242_v2  ;;  %v681_v2 = vld [vmem:[#allocation2 + $0x18] sm:$0xff]  ;;  %v892_v25 = vld [vmem:[%s1390_s2] ss:$0 sm:$0xff] }
  0x72   :  { %v1003_v5 = vpack.c.bf16 %v681_v2, %v680_v63 }
  0x73   :  { %v262_v36 = vsub.f32 %v260_v28, %v261_v30  ;;  %v265_v37 = vadd.f32 %v264_v34, %v263_v32 }
  0x74   :  { %1004 = vmatpush3.bf16.msra.mxu1 %v1003_v5 }
  0x75   :  { %279 = vrot.lane.b32.xlu1 %v262_v36, %s1155_s24  ;;  %295 = vrot.lane.b32.xlu0 %v265_v37, %s1151_s21 }
  0x79   :  { %291 = vrot.lane.b32.xlu1 %v253_v19, %s1156_s25  ;;  %v686_v19 = vld [vmem:[#allocation2 + $0x40] sm:$0xff] }
  0x7a   :  { %v1015_v23 = vpack.c.bf16 %v687_v20, %v686_v19 }
  0xd6   :  { %v284_v38 = vpop.permute.xlu0 %283 }
  0xda   :  { %v268_v39 = vpop.permute.xlu0 %267  ;;  %v288_v40 = vpop.permute.xlu1 %287 }
  0xdb   :  { %v299_v41 = vsel %vm298_vm0, %v138_v3, %v268_v39  ;;  %v698_v3 = vld [vmem:[#allocation2 + $0xa0] sm:$0xff] }
  0xdc   :  { %v1005_v6 = vpack.c.bf16 %v699_v4, %v698_v3 }
  0xde   :  { %1006 = vmatprep.subr.bf16.mxu1 %v1005_v6 }
  0xdf   :  { %v272_v42 = vpop.permute.xlu0 %271  ;;  %1008 = vmatpush3.bf16.msra.mxu1 %v1007_v11 }
  0xe0   :  { %v301_v45 = vsel %vm300_vm1, %v299_v41, %v272_v42  ;;  %1010 = vmatprep.subr.bf16.mxu1 %v1009_v12 }
  0xe3   :  { %v276_v44 = vpop.permute.xlu1 %275  ;;  %1012 = vmatpush3.bf16.msra.mxu1 %v1011_v17 }
  0xe4   :  { %v303_v46 = vsel %vm302_vm2, %v301_v45, %v276_v44  ;;  %1014 = vmatprep.subr.bf16.mxu1 %v1013_v18 }
  0xe7   :  { %v280_v47 = vpop.permute.xlu1 %279  ;;  %v296_v48 = vpop.permute.xlu0 %295  ;;  %1016 = vmatpush3.bf16.msra.mxu1 %v1015_v23 }
  0xe8   :  { %v305_v49 = vsel %vm304_vm3, %v303_v46, %v280_v47  ;;  %v312_v50 = vsel %vm298_vm0, %v259_v26, %v296_v48  ;;  %1018 = vmatprep.subr.bf16.mxu1 %v1017_v24 }
  0xe9   :  { %v307_v9 = vsel %vm306_vm4, %v305_v49, %v284_v38  ;;  %893 = vmatprep.mubr.msk.f32.mxu0 %vm300_vm1, %v312_v50 }
  0xea   :  { %v309_v51 = vsel %vm308_vm5, %v307_v9, %v288_v40 }
  0xeb   :  { %v292_v52 = vpop.permute.xlu1 %291 }
  0xec   :  { %v311_v53 = vsel %vm310_vm6, %v309_v51, %v292_v52 }
  0xed   :  { %408 = vmatmul.mubr.f32.vlgmr.msra.gmra.mrb[0].mxu0 %v311_v53 }
 0x1c0   :  { %v409_v26 = vpop.f32.mrb[0].mxu0 }
 0x1c1   :  { %v1325_v28 = vadd.f32 %v892_v25, %v409_v26  ;;  %v411_v30 = vpop.f32.mrb[1].mxu0 }
 0x1c3   :  { %v416_v32 = vand.u32 2139095040, %v1325_v28  ;;  %v413_v38 = vand.u32 2147483647, %v1325_v28  ;;  %vm415_vm14 = vcmp.lt.s32.totalorder %v1325_v28, 0 }
 0x1c5   :  { %v417_v34 = vshrl.u32 %v416_v32, 23  ;;  %v420_v41 = vand.u32 8388607, %v413_v38  ;;  %vm414_vm15 = vcmp.le.f32.partialorder %v413_v38, 0.7853982 }
 0x1c7   :  { %v894_v36 = vadd.s32 4294967169, %v417_v34  ;;  %v421_v54 = vor.u32 8388608, %v420_v41 }
 0x1c9   :  { %v423_v37 = vadd.s32 1, %v894_v36 }
 0x1cb   :  { %vm424_vm7 = vcmp.gt.s32.totalorder %v423_v37, 0 }
 0x1cc   :  { %v425_v39 = vsel %vm424_vm7, %v423_v37, 0 }
 0x1cd   :  { %v427_v40 = vand.u32 31, %v425_v39  ;;  %v426_v44 = vshrl.u32 %v425_v39, 5 }
 0x1cf   :  { %v428_v42 = vsub.s32 32, %v427_v40  ;;  %v430_v45 = vshll.u32 %v1144_v27, %v427_v40  ;;  %v433_v46 = vshll.u32 %v1145_v29, %v427_v40  ;;  %v436_v49 = vshll.u32 %v1146_v31, %v427_v40 }
 0x1d0   :  { %v439_v9 = vshll.u32 %v1147_v33, %v427_v40  ;;  %v442_v52 = vshll.u32 %v1148_v35, %v427_v40  ;;  %vm445_vm8 = vcmp.lt.s32.totalorder %v426_v44, 1  ;;  %vm448_vm9 = vcmp.lt.s32.totalorder %v426_v44, 4 }
 0x1d1   :  { %v431_v47 = vshrl.u32 %v1145_v29, %v428_v42  ;;  %v434_v48 = vshrl.u32 %v1146_v31, %v428_v42  ;;  %v437_v50 = vshrl.u32 %v1147_v33, %v428_v42  ;;  %v440_v51 = vshrl.u32 %v1148_v35, %v428_v42 }
 0x1d2   :  { %v443_v53 = vshrl.u32 %v1149_v43, %v428_v42  ;;  %v429_v61 = vshrl.u32 %v1144_v27, %v428_v42  ;;  %vm447_vm10 = vcmp.lt.s32.totalorder %v426_v44, 3  ;;  %vm446_vm11 = vcmp.lt.s32.totalorder %v426_v44, 2 }
 0x1d3   :  { %v432_v55 = vor.u32 %v431_v47, %v430_v45  ;;  %v435_v56 = vor.u32 %v434_v48, %v433_v46  ;;  %v438_v57 = vor.u32 %v437_v50, %v436_v49  ;;  %v441_v58 = vor.u32 %v440_v51, %v439_v9  ;;  %v688_v51 = vld [vmem:[#allocation2 + $0x50] sm:$0xff] }
 0x1d4   :  { %v444_v29 = vor.u32 %v443_v53, %v442_v52  ;;  %v461_v43 = vshll.u32 %v421_v54, 8  ;;  %v689_v52 = vld [vmem:[#allocation2 + $0x58] sm:$0xff] }
 0x1d5   :  { %v450_v59 = vsel %vm448_vm9, %v438_v57, 2102212464  ;;  %v453_v31 = vsel %vm445_vm8, %v432_v55, %v435_v56  ;;  %v457_v60 = vsel %vm445_vm8, %v435_v56, %v438_v57  ;;  %v454_v33 = vsel %vm448_vm9, %v441_v58, 920167782 }
 0x1d6   :  { %v458_v62 = vsel %vm448_vm9, %v444_v29, 1326507024  ;;  %v455_v35 = vsel %vm447_vm10, %v438_v57, %v454_v33  ;;  %v449_v2 = vsel %vm445_vm8, %v429_v61, %v432_v55  ;;  %v451_v3 = vsel %vm447_vm10, %v435_v56, %v450_v59  ;;  %v706_v55 = vld [vmem:[#allocation2 + $0xe0] sm:$0xff]  ;;  %v707_v56 = vld [vmem:[#allocation2 + $0xe8] sm:$0xff] }
 0x1d7   :  { %v459_v63 = vsel %vm447_vm10, %v441_v58, %v458_v62  ;;  %v456_v4 = vsel %vm446_vm11, %v453_v31, %v455_v35  ;;  %v452_v10 = vsel %vm446_vm11, %v449_v2, %v451_v3  ;;  %v1019_v53 = vpack.c.bf16 %v689_v52, %v688_v51  ;;  %v690_v59 = vld [vmem:[#allocation2 + $0x60] sm:$0xff]  ;;  %v691_v31 = vld [vmem:[#allocation2 + $0x68] sm:$0xff] }
 0x1d8   :  { %v460_v5 = vsel %vm446_vm11, %v457_v60, %v459_v63  ;;  %v1345_v7 = vmul.u32.u64.low %v461_v43, %v456_v4  ;;  %v1346_v8 = vmul.u32.u64.high %v461_v43, %v456_v4, %v1345_v7  ;;  %v468_v11 = vmul.u32 %v461_v43, %v452_v10  ;;  %v708_v63 = vld [vmem:[#allocation2 + $0xf0] sm:$0xff] }
 0x1d9   :  { %v1342_v6 = vmul.u32.u64.low %v461_v43, %v460_v5  ;;  %v1343_v1 = vmul.u32.u64.high %v461_v43, %v460_v5, %v1342_v6  ;;  %1020 = vmatpush3.bf16.msra.mxu1 %v1019_v53  ;;  %v1021_v38 = vpack.c.bf16 %v707_v56, %v706_v55  ;;  %v1023_v33 = vpack.c.bf16 %v691_v31, %v690_v59  ;;  %v709_v43 = vld [vmem:[#allocation2 + $0xf8] sm:$0xff] }
 0x1da   :  { %v471_v27 = vadd.s32 1, %v1346_v8  ;;  %vm505_vm9 = vweird.f32 %v1325_v28  ;;  %v1025_v4 = vpack.c.bf16 %v709_v43, %v708_v63  ;;  %vm1157_vm10 = vmmov 0  }
 0x1db   :  { %vm470_vm12 = vc.u32 %v1343_v1, %v1345_v7  ;;  %v469_v23 = vadd.s32 %v1345_v7, %v1343_v1  ;;  %1022 = vmatprep.subr.bf16.mxu1 %v1021_v38  ;;  %v692_v1 = vld [vmem:[#allocation2 + $0x70] sm:$0xff]  ;;  %v693_v7 = vld [vmem:[#allocation2 + $0x78] sm:$0xff]  ;;  %v1158_v31 = vmov 0.0  }
 0x1dc   :  { %v472_v12 = vsel %vm470_vm12, %v471_v27, %v1346_v8  ;;  %v712_v38 = vld [vmem:[#allocation2 + $0x110] sm:$0xff] }
 0x1dd   :  { %v473_v13 = vadd.s32 %v472_v12, %v468_v11  ;;  %1024 = vmatpush3.bf16.msra.mxu1 %v1023_v33  ;;  %v1027_v11 = vpack.c.bf16 %v693_v7, %v692_v1 }
 0x1de   :  { %1026 = vmatprep.subr.bf16.mxu1 %v1025_v4 }
 0x1df   :  { %v474_v14 = vadd.s32 536870912, %v473_v13 }
 0x1e1   :  { %v475_v15 = vshrl.u32 %v474_v14, 30  ;;  %1028 = vmatpush3.bf16.msra.mxu1 %v1027_v11 }
 0x1e2   :  { %1029 = vmatprep.subr.bf16.mxu1 %v1143_v0 }
 0x1e3   :  { %v476_v16 = vshll.u32 %v475_v15, 30  ;;  %v499_v42 = vsub.s32 4, %v475_v15 }
 0x1e5   :  { %v477_v17 = vsub.s32 %v473_v13, %v476_v16  ;;  %v500_v46 = vsel %vm415_vm14, %v499_v42, %v475_v15 }
 0x1e6   :  { %v502_v48 = vsel %vm414_vm15, 0, %v500_v46 }
 0x1e7   :  { %v479_v18 = vsub.s32 0, %v477_v17  ;;  %v609_v49 = vadd.s32 3, %v502_v48  ;;  %v506_v50 = vand.u32 3, %v502_v48  ;;  %v710_v48 = vld [vmem:[#allocation2 + $0x100] sm:$0xff] }
 0x1e9   :  { %v895_v19 = vmin.u32 %v479_v18, %v477_v17  ;;  %v610_v9 = vand.u32 3, %v609_v49  ;;  %vm508_vm0 = vcmp.eq.s32.totalorder %v506_v50, 0  ;;  %vm511_vm2 = vcmp.eq.s32.totalorder %v506_v50, 2  ;;  %v711_v49 = vld [vmem:[#allocation2 + $0x108] sm:$0xff] }
 0x1ea   :  { %vm507_vm7 = vcmp.lt.s32.totalorder %v506_v50, 2  ;;  %v1030_v56 = vpack.c.bf16 %v711_v49, %v710_v48 }
 0x1eb   :  { %v481_v20 = vclz %v895_v19  ;;  %vm615_vm4 = vcmp.eq.s32.totalorder %v610_v9, 2  ;;  %vm612_vm6 = vcmp.eq.s32.totalorder %v610_v9, 0  ;;  %vm611_vm8 = vcmp.lt.s32.totalorder %v610_v9, 2 }
 0x1ed   :  { %v896_v21 = vadd.s32 4294967294, %v481_v20 }
 0x1ef   :  { %vm897_vm13 = vcmp.lt.s32.totalorder %v896_v21, 0 }
 0x1f0   :  { %v484_v22 = vsel %vm897_vm13, 0, %v896_v21 }
 0x1f1   :  { %v485_v24 = vsub.s32 32, %v484_v22  ;;  %v489_v25 = vsub.s32 4294967266, %v484_v22  ;;  %v486_v26 = vshll.u32 %v477_v17, %v484_v22 }
 0x1f3   :  { %v487_v30 = vshrl.u32 %v469_v23, %v485_v24  ;;  %v490_v32 = vadd.s32 127, %v489_v25 }
 0x1f5   :  { %v488_v34 = vor.u32 %v487_v30, %v486_v26  ;;  %v491_v36 = vshll.u32 %v490_v32, 23 }
 0x1f7   :  { %v492_v37 = vor.u32 4788187, %v491_v36  ;;  %v495_v40 = vcvt.s32.f32 %v488_v34 }
 0x1f9   :  { %v493_v39 = vand.u32 2147483647, %v492_v37 }
 0x1fb   :  { %v496_v41 = vmul.f32 %v495_v40, %v493_v39 }
 0x1fd   :  { %v497_v44 = vxor.u32 2147483648, %v496_v41 }
 0x1ff   :  { %v498_v45 = vsel %vm415_vm14, %v497_v44, %v496_v41 }
 0x200   :  { %v501_v47 = vsel %vm414_vm15, %v1325_v28, %v498_v45 }
 0x201   :  { %1088 = vcosq.f32 %v501_v47 }
 0x202   :  { %1090 = vsinq.f32 %v501_v47 }
 0x20b   :  { %v1089_v54 = vpop.eup %1088 }
 0x20c   :  { %v1091_v57 = vpop.eup %1090  ;;  %v512_v58 = vxor.u32 2147483648, %v1089_v54 }
 0x20d   :  { %v509_v29 = vxor.u32 2147483648, %v1091_v57 }
 0x20e   :  { %v513_v60 = vsel %vm511_vm2, %v512_v58, %v1091_v57  ;;  %v617_v61 = vsel %vm615_vm4, %v512_v58, %v1091_v57 }
 0x20f   :  { %v510_v62 = vsel %vm508_vm0, %v1089_v54, %v509_v29  ;;  %v614_v35 = vsel %vm612_vm6, %v1089_v54, %v509_v29  ;;  %v713_v29 = vld [vmem:[#allocation2 + $0x118] sm:$0xff] }
 0x210   :  { %v514_v2 = vsel %vm507_vm7, %v510_v62, %v513_v60  ;;  %v618_v3 = vsel %vm611_vm8, %v614_v35, %v617_v61  ;;  %v1033_v59 = vpack.c.bf16 %v713_v29, %v712_v38  ;;  %v714_v60 = vld [vmem:[#allocation2 + $0x120] sm:$0xff]  ;;  %v715_v61 = vld [vmem:[#allocation2 + $0x128] sm:$0xff]  ;;  %v716_v62 = vld [vmem:[#allocation2 + $0x130] sm:$0xff] }
 0x211   :  { %v515_v5 = vsel %vm505_vm9, nan, %v514_v2  ;;  %v619_v6 = vsel %vm505_vm9, nan, %v618_v3  ;;  %v1036_v33 = vpack.c.bf16 %v715_v61, %v714_v60  ;;  %v717_v35 = vld [vmem:[#allocation2 + $0x138] sm:$0xff] }
 0x212   :  { %v620_v8 = vmul.f32 %v515_v5, %v515_v5  ;;  %v621_v10 = vmul.f32 %v619_v6, %v619_v6  ;;  %v623_v27 = vmul.f32 %v619_v6, %v515_v5  ;;  %v1039_v63 = vpack.c.bf16 %v717_v35, %v716_v62 }
 0x214   :  { %v622_v12 = vsub.f32 %v620_v8, %v621_v10  ;;  %v624_v13 = vadd.f32 %v623_v27, %v623_v27 }
 0x216   :  { %v1069_v14 = vpack.i.bf16 %v622_v12, %v619_v6  ;;  %v625_v28 = vmul.f32 %v622_v12, %v515_v5  ;;  %v626_v15 = vmul.f32 %v624_v13, %v619_v6  ;;  %v628_v16 = vmul.f32 %v624_v13, %v515_v5 }
 0x217   :  { %v629_v17 = vmul.f32 %v622_v12, %v619_v6 }
 0x218   :  { %1070 = vrot.lane.b32.xlu0 %v1069_v14, %s1153_s23  ;;  %v627_v18 = vsub.f32 %v625_v28, %v626_v15 }
 0x219   :  { %v630_v19 = vadd.f32 %v629_v17, %v628_v16 }
 0x21a   :  { %v1074_v20 = vpack.i.bf16 %v627_v18, %v624_v13  ;;  %v631_v21 = vmul.f32 %v627_v18, %v515_v5  ;;  %v635_v22 = vmul.f32 %v627_v18, %v619_v6 }
 0x21b   :  { %v632_v23 = vmul.f32 %v630_v19, %v619_v6  ;;  %v634_v24 = vmul.f32 %v630_v19, %v515_v5 }
 0x21c   :  { %1075 = vrot.lane.b32.xlu1 %v1074_v20, %s1155_s24 }
 0x21d   :  { %v633_v25 = vsub.f32 %v631_v21, %v632_v23  ;;  %v636_v26 = vadd.f32 %v635_v22, %v634_v24 }
 0x21f   :  { %v1079_v30 = vpack.i.bf16 %v633_v25, %v630_v19  ;;  %v640_v32 = vmul.f32 %v636_v26, %v515_v5  ;;  %v641_v34 = vmul.f32 %v633_v25, %v619_v6  ;;  %v637_v36 = vmul.f32 %v633_v25, %v515_v5 }
 0x220   :  { %v638_v37 = vmul.f32 %v636_v26, %v619_v6  ;;  %v902_v6 = vld [vmem:[%s1392_s4] ss:$0 sm:$0xff] }
 0x221   :  { %1080 = vrot.lane.b32.xlu0 %v1079_v30, %s1152_s22  ;;  %v642_v39 = vadd.f32 %v641_v34, %v640_v32 }
 0x222   :  { %v639_v40 = vsub.f32 %v637_v36, %v638_v37 }
 0x223   :  { %668 = vrot.lane.b32.xlu1 %v642_v39, %s1153_s23 }
 0x28a   :  { %v1071_v41 = vpop.permute.xlu0 %1070 }
 0x28b   :  { %v1073_v44 = vunpack.i.h.bf16 %v1071_v41  ;;  %v1072_v45 = vunpack.i.l.bf16 %v1071_v41 }
 0x28d   :  { %v674_v52 = vsel %vm300_vm1, %v639_v40, %v1072_v45  ;;  %v671_v53 = vsel %vm300_vm1, %v515_v5, %v1073_v44 }
 0x28e   :  { %v1076_v42 = vpop.permute.xlu1 %1075 }
 0x28f   :  { %v1078_v46 = vunpack.i.h.bf16 %v1076_v42  ;;  %v1077_v47 = vunpack.i.l.bf16 %v1076_v42 }
 0x291   :  { %v675_v54 = vsel %vm304_vm3, %v674_v52, %v1077_v47  ;;  %v672_v55 = vsel %vm304_vm3, %v671_v53, %v1078_v46 }
 0x293   :  { %v1081_v50 = vpop.permute.xlu0 %1080 }
 0x294   :  { %v1083_v9 = vunpack.i.h.bf16 %v1081_v50  ;;  %v1082_v51 = vunpack.i.l.bf16 %v1081_v50 }
 0x295   :  { %v669_v43 = vpop.permute.xlu1 %668 }
 0x296   :  { %v676_v57 = vsel %vm308_vm5, %v675_v54, %v1082_v51  ;;  %v673_v58 = vsel %vm308_vm5, %v672_v55, %v1083_v9  ;;  %v677_v2 = vsel %vm300_vm1, %v636_v26, %v669_v43 }
 0x297   :  { %792 = vmatprep.mubr.f32.mxu1 %v676_v57 }
 0x298   :  { %793 = vmatmul.mubr.f32.vlgmr.msra.gmra.mrb[0].mxu1 %v673_v58 }
 0x299   :  { %1031 = vmatpush3.bf16.msra.mxu1 %v1030_v56  ;;  %964 = vmatprep.mubr.msk.f32.mxu1 %vm1157_vm10, %v1158_v31 }
 0x29a   :  { %1032 = vmatprep.subr.bf16.mxu1 %v1143_v0 }
 0x29d   :  { %1034 = vmatpush3.bf16.msra.mxu1 %v1033_v59 }
 0x29e   :  { %1035 = vmatprep.subr.bf16.mxu1 %v1143_v0 }
 0x2a1   :  { %1037 = vmatpush3.bf16.msra.mxu1 %v1036_v33 }
 0x2a2   :  { %1038 = vmatprep.subr.bf16.mxu1 %v1143_v0 }
 0x2a5   :  { %1040 = vmatpush3.bf16.msra.mxu1 %v1039_v63 }
 0x2a8   :  { %965 = vmatmul.mubr.msk.f32.vlgmr.msra.gmra.mrb[2].mxu1 %vm304_vm3, %v677_v2 }
 0x36b   :  { %v936_v3 = vpop.f32.mrb[0].mxu1 }
 0x36c   :  { %v937_v4 = vpop.f32.mrb[1].mxu1 }
 0x36d   :  { %v938_v5 = vadd.f32 %v937_v4, %v936_v3 }
 0x36f   :  { %v795_v1 = vadd.f32 %v938_v5, %v902_v6 }
 0x37b   :  { %v864_v7 = vpop.f32.mrb[2].mxu1 }
 0x37c   :  { %v865_v8 = vadd.f32 %v864_v7, %v795_v1  ;;  %v966_v10 = vpop.f32.mrb[3].mxu1 }
 0x37e   :  { %868 = vst [vmem:[#allocation5] sm:$0xff] %v865_v8 }
 0x37f   :  { %1125 = shalt.err (!%p1122_p12)
}
 0x380   :  { %s1126_s9 = scalar_lea.hbm %s1393_s5, 128 }
 0x381   :  { %p1127_p13 = scmp.ne.s32.totalorder %s1393_s5, %s1126_s9  ;;  %p1130_p0 = scmp.lt.u32.totalorder %s1126_s9, %s1393_s5 }
 0x383   :  { %p1132_p1 = pnand %p1130_p0, %p1127_p13 }
 0x385   :  { %1135 = shalt.err (!%p1132_p1)
}
 0x386   :  { %878 = dma.vmem_to_hbm [thread:$0]  %s876_s30, 128, %s1393_s5, [#allocation4]  }
 0x387   :  { %1138 = dma.done.wait [#allocation4], 128  }
 0x388   :  { %1139 = vsyncadd [#allocation4], 4294967168 }
 0x389   :  { %882 = vsyncpa [#allocation3], 1 }
 0x38a   :  { %883 = vsyncpa [#allocation4], 1 }

</bundles_post_ra>
